<compile_context>
chip_gen: v6e
topology: v6e:2x2x1
jax: 0.10.0
libtpu: 0.0.40
codegen_flags: <defaults>
</compile_context>

<pallas_src>
import functools
import math

import jax
import jax.numpy as jnp
from jax import lax
from jax.experimental import pallas as pl
from jax.experimental.pallas import tpu as pltpu

_LANES = 128


def _detect_tpu():
    """Return (num_tensorcores, vmem_capacity_bytes) with safe fallbacks."""
    vmem_cap = 64 * 1024 * 1024     # conservative (v7x per-TC VMEM)
    num_cores = 1
    try:
        info = pltpu.get_tpu_info()
        cap = getattr(info, "vmem_capacity_bytes", None)
        if cap:
            vmem_cap = int(cap)
        for name in ("num_tensorcores", "tensorcore_count", "num_cores",
                     "cores_per_chip"):
            val = getattr(info, name, None)
            if val:
                num_cores = int(val)
                break
    except Exception:
        pass
    if num_cores == 1:
        try:
            kind = jax.devices()[0].device_kind.lower()
            if (("v4" in kind and "lite" not in kind) or "v5p" in kind
                    or "v7" in kind or "7x" in kind):
                num_cores = 2
        except Exception:
            pass
    return num_cores, vmem_cap


def _der_kernel(y_ref, g_ref, v_ref, a_ref, b_ref,      # inputs (row blocks)
                nll_out, reg_out, *rest,                 # outputs
                nb_inner, bre, rows_valid, needs_mask, emit_reg):
    if emit_reg:
        (reg_elem_ref,) = rest

    p = pl.program_id(0)
    i = pl.program_id(1)

    # Zero the per-core resident partial-sum blocks on the first inner step.
    @pl.when(i == 0)
    def _():
        nll_out[...] = jnp.zeros_like(nll_out)
        reg_out[...] = jnp.zeros_like(reg_out)

    y = y_ref[...].astype(jnp.float32)
    gamma = g_ref[...].astype(jnp.float32)
    v = v_ref[...].astype(jnp.float32)
    alpha = a_ref[...].astype(jnp.float32)
    beta = b_ref[...].astype(jnp.float32)

    d = y - gamma
    vd2 = v * d * d
    big_b = 2.0 * beta * (1.0 + v)            # 2*beta*(1+v)
    s = vd2 + big_b                           # v*d^2 + 2*beta*(1+v)
    z = alpha + 2.0
    r = 0.5 / z

    # lgamma(a) - lgamma(a+0.5): exact recurrence shift by 2 plus a one-term
    # Stirling difference at z = a+2 (>= 3 for DER's a >= 1); abs err < ~6e-5.
    shift = jnp.log(((alpha + 0.5) * (alpha + 1.5)) / (alpha * (alpha + 1.0)))
    # ~ 1/(24*z*(z+0.5)) without an extra EUP op (pure VPU polynomial).
    corr = (r * r) * ((1.0 / 6.0) * (1.0 - r + r * r))

    # NLL regrouped to 4 logs + 4 exact divides per element:
    #   0.5*log(pi/v) - a*log(B) + (a+0.5)*log(S) + lgamma(a) - lgamma(a+0.5)
    # = 0.5*log(pi*S/(v*z)) + a*log(1 + v*d^2/B)
    #   + shift - z*log(1 + 0.5/z) + 0.5 + corr
    # (log(1+x) instead of log1p is fine here: only absolute accuracy of the
    #  per-element nll matters and the arguments are never denormal-tiny.)
    nll = (0.5 * jnp.log((math.pi * s) / (v * z))
           + alpha * jnp.log(1.0 + vd2 / big_b)
           + shift - z * jnp.log(1.0 + r) + 0.5 + corr)
    reg = jnp.abs(d) * (2.0 * v * alpha)

    if emit_reg:
        reg_elem_ref[...] = reg.astype(reg_elem_ref.dtype)

    def _acc(nv, rv):
        # Per-lane partial sums accumulated into the resident output blocks.
        nll_out[...] += jnp.sum(nv, axis=0, keepdims=True).reshape(1, 1, _LANES)
        reg_out[...] += jnp.sum(rv, axis=0, keepdims=True).reshape(1, 1, _LANES)

    if needs_mask:
        gb = p * nb_inner + i              # global (unclamped) row-block index
        row0 = gb * bre
        full = row0 + bre <= rows_valid

        @pl.when(full)
        def _():                           # interior blocks: fully valid
            _acc(nll, reg)

        @pl.when(jnp.logical_not(full))
        def _():                           # ragged tail / clamped overflow
            ridx = lax.broadcasted_iota(jnp.int32, nll.shape, 0)
            mask = (row0 + ridx) < rows_valid
            _acc(jnp.where(mask, nll, 0.0), jnp.where(mask, reg, 0.0))
    else:
        _acc(nll, reg)


def _nig_terms_ref(yv, gv, vv, av, bv):
    """Plain-JAX per-element NLL/Reg (exact lgamma) — remainder + reference."""
    two_bl = 2.0 * bv * (1.0 + vv)
    nll = (0.5 * jnp.log(jnp.pi / vv) - av * jnp.log(two_bl)
           + (av + 0.5) * jnp.log(vv * (yv - gv) ** 2 + two_bl)
           + lax.lgamma(av) - lax.lgamma(av + 0.5))
    reg = jnp.abs(yv - gv) * 2.0 * vv * av
    return nll, reg


def der_loss_ref(y, gamma, v, alpha, beta, coeff=1.0, reduce=True):
    """Mirrors the PyTorch DER_Loss.forward."""
    ts = [jnp.asarray(t, jnp.float32) for t in (y, gamma, v, alpha, beta)]
    nll, reg = _nig_terms_ref(*ts)
    loss_reg = jnp.mean(reg) if reduce else reg
    return jnp.mean(nll) + coeff * loss_reg


def der_loss(y, gamma, v, alpha, beta, *, coeff=1.0, reduce=True,
             block_rows=None, num_cores=None):
    """Pallas equivalent of DER_Loss(coeff, reduce)(y, gamma, v, alpha, beta)."""
    y, gamma, v, alpha, beta = map(jnp.asarray, (y, gamma, v, alpha, beta))
    orig_shape = y.shape
    n = int(y.size)

    def _flat(x):
        if x.dtype != jnp.bfloat16:      # keep bf16 inputs (halves HBM traffic)
            x = x.astype(jnp.float32)
        return x.reshape(-1)

    flats = [_flat(t) for t in (y, gamma, v, alpha, beta)]

    rows_valid = n // _LANES
    n_aligned = rows_valid * _LANES
    rem = n - n_aligned

    # Ragged remainder (< 128 elements) — and the rows_valid == 0 tiny-input
    # fallback — are handled in plain JAX (exact lgamma, negligible cost).
    if rem or rows_valid == 0:
        tails = [f[n_aligned:].astype(jnp.float32) for f in flats]
        nll_t, reg_t = _nig_terms_ref(*tails)
        nll_tail_sum = jnp.sum(nll_t)
        reg_tail_sum = jnp.sum(reg_t)
    else:
        reg_t = None
        nll_tail_sum = 0.0
        reg_tail_sum = 0.0

    if rows_valid == 0:
        loss_nll = nll_tail_sum / n
        if reduce:
            return loss_nll + coeff * (reg_tail_sum / n)
        return loss_nll + coeff * reg_t.reshape(orig_shape)

    num_cores_det, vmem_cap = _detect_tpu()
    if num_cores is None:
        num_cores = num_cores_det

    emit_reg = not reduce
    n_streams = 5 + (1 if emit_reg else 0)

    # Largest row-block whose double-buffered streams fit ~40% of physical
    # VMEM (f32 worst case): ~8192 rows on 128 MiB v5e/v6e, ~5k on 64 MiB v7x.
    max_bre = (int(vmem_cap * 0.4) // (n_streams * 2 * _LANES * 4) // 8) * 8
    max_bre = max(8, min(8192, max_bre))
    if block_rows is None:
        block_rows = max_bre
    if rows_valid <= block_rows:
        bre = rows_valid                       # single block == full array dim
    else:
        bre = max(8, min((block_rows // 8) * 8, max_bre))
    nb_needed = pl.cdiv(rows_valid, bre)

    # Leading parallel axis only on multi-TensorCore chips, and only when each
    # core gets >= 2 inner steps so the pipeline actually overlaps.
    num_par = 2 if (reduce and num_cores >= 2 and nb_needed >= 4) else 1
    nb_inner = pl.cdiv(nb_needed, num_par)
    needs_mask = (num_par * nb_inner * bre != rows_valid)
    assert not (emit_reg and num_par != 1)

    def in_map(p, i):
        # Clamp overflow blocks (num_par not dividing nb_needed) to the last
        # valid block; their contribution is masked out in the kernel.
        return (jnp.minimum(p * nb_inner + i, nb_needed - 1), 0)

    in_spec = pl.BlockSpec((bre, _LANES), in_map)
    part_spec = pl.BlockSpec((1, 1, _LANES), lambda p, i: (p, 0, 0))

    out_shape = [jax.ShapeDtypeStruct((num_par, 1, _LANES), jnp.float32),
                 jax.ShapeDtypeStruct((num_par, 1, _LANES), jnp.float32)]
    out_specs = [part_spec, part_spec]
    reg_dtype = jnp.bfloat16 if y.dtype == jnp.bfloat16 else jnp.float32
    if emit_reg:
        # Elementwise reg (reduce=False only); Pallas clips the partial last
        # block write, so the output is exactly (rows_valid, 128).
        out_shape.append(jax.ShapeDtypeStruct((rows_valid, _LANES), reg_dtype))
        out_specs.append(pl.BlockSpec((bre, _LANES),
                                      lambda p, i: (p * nb_inner + i, 0)))

    mains = [f[:n_aligned].reshape(rows_valid, _LANES) for f in flats]

    kernel = functools.partial(
        _der_kernel, nb_inner=nb_inner, bre=bre, rows_valid=rows_valid,
        needs_mask=needs_mask, emit_reg=emit_reg)

    in_bytes = sum(int(m.size) * m.dtype.itemsize for m in mains)
    out_bytes = sum(math.prod(s.shape) * s.dtype.itemsize for s in out_shape)
    cost = pl.CostEstimate(flops=45 * n_aligned, transcendentals=8 * n_aligned,
                           bytes_accessed=in_bytes + out_bytes)

    vmem_need = n_streams * 2 * bre * _LANES * 4 + (16 << 20)
    vmem_limit = max(32 << 20, min(int(vmem_cap * 3 // 4), vmem_need))

    outs = pl.pallas_call(
        kernel,
        out_shape=tuple(out_shape),
        grid_spec=pltpu.PrefetchScalarGridSpec(
            num_scalar_prefetch=0,
            grid=(num_par, nb_inner),
            in_specs=[in_spec] * 5,
            out_specs=tuple(out_specs)),
        compiler_params=pltpu.CompilerParams(
            dimension_semantics=("parallel", "arbitrary"),
            vmem_limit_bytes=int(vmem_limit)),
        cost_estimate=cost,
    )(*mains)

    inv_n = 1.0 / n
    loss_nll = (jnp.sum(outs[0]) + nll_tail_sum) * inv_n   # NLL is always a mean
    if reduce:
        return loss_nll + coeff * ((jnp.sum(outs[1]) + reg_tail_sum) * inv_n)

    reg_main = outs[2].reshape(-1).astype(jnp.float32)
    if rem:
        reg_flat = jnp.concatenate([reg_main, reg_t.astype(jnp.float32)])
    else:
        reg_flat = reg_main
    return loss_nll + coeff * reg_flat.reshape(orig_shape)


if __name__ == "__main__":
    def make_inputs(shape, key):
        k1, k2, k3, k4, k5 = jax.random.split(key, 5)
        y = jax.random.normal(k1, shape, jnp.float32)
        gamma = jax.random.normal(k2, shape, jnp.float32)
        v = jax.nn.softplus(jax.random.normal(k3, shape, jnp.float32)) + 0.1
        alpha = jax.nn.softplus(jax.random.normal(k4, shape, jnp.float32)) + 1.0
        beta = jax.nn.softplus(jax.random.normal(k5, shape, jnp.float32)) + 0.1
        return y, gamma, v, alpha, beta

    k0, k1, k2, k3 = jax.random.split(jax.random.PRNGKey(0), 4)

    # 1) Small aligned batch, reduce=True (scalar loss).
    a1 = make_inputs((8, 32), k0)
    out = jax.block_until_ready(der_loss(*a1, coeff=1.0, reduce=True))
    ref = der_loss_ref(*a1, coeff=1.0, reduce=True)
    assert jnp.allclose(out, ref, rtol=1e-3, atol=1e-3), (out, ref)

    # 2) reduce=False (elementwise reg output).
    out_e = jax.block_until_ready(der_loss(*a1, coeff=0.5, reduce=False))
    ref_e = der_loss_ref(*a1, coeff=0.5, reduce=False)
    assert jnp.allclose(out_e, ref_e, rtol=1e-3, atol=1e-3)

    # 3) Multi-block grid with a ragged row tail (small block_rows forces it).
    a2 = make_inputs((16, 760), k1)
    out2 = jax.block_until_ready(
        der_loss(*a2, coeff=1.0, reduce=True, block_rows=32))
    ref2 = der_loss_ref(*a2, coeff=1.0, reduce=True)
    assert jnp.allclose(out2, ref2, rtol=1e-3, atol=1e-3), (out2, ref2)

    # 4) Ragged element count (n % 128 != 0) -> plain-JAX remainder path.
    a3 = make_inputs((7, 300), k2)
    out3 = jax.block_until_ready(der_loss(*a3, coeff=2.0, reduce=True))
    ref3 = der_loss_ref(*a3, coeff=2.0, reduce=True)
    assert jnp.allclose(out3, ref3, rtol=1e-3, atol=1e-3), (out3, ref3)

    # 5) Multi-block, aligned; exercises the leading parallel axis on
    #    multi-TensorCore chips (harmless size-1 axis elsewhere).
    a4 = make_inputs((8, 1024), k3)
    out4 = jax.block_until_ready(
        der_loss(*a4, coeff=1.0, reduce=True, block_rows=16))
    ref4 = der_loss_ref(*a4, coeff=1.0, reduce=True)
    assert jnp.allclose(out4, ref4, rtol=1e-3, atol=1e-3), (out4, ref4)

    print("KERNEL_OK")
</pallas_src>

<mosaic_0001>
module attributes {stable_mosaic.version = 11 : i64} {
  func.func @_der_kernel(%arg0: i32, %arg1: i32, %arg2: memref<2x128xf32, #tpu.memory_space<vmem>>, %arg3: memref<2x128xf32, #tpu.memory_space<vmem>>, %arg4: memref<2x128xf32, #tpu.memory_space<vmem>>, %arg5: memref<2x128xf32, #tpu.memory_space<vmem>>, %arg6: memref<2x128xf32, #tpu.memory_space<vmem>>, %arg7: memref<1x1x128xf32, #tpu.memory_space<vmem>>, %arg8: memref<1x1x128xf32, #tpu.memory_space<vmem>>) attributes {dimension_semantics = [#tpu.dimension_semantics<parallel>, #tpu.dimension_semantics<arbitrary>], iteration_bounds = array<i64: 1, 1>, scalar_prefetch = 0 : i64, scratch_operands = 0 : i64, tpu.core_type = #tpu.core_type<tc>, window_params = [{transform_indices = @transform_0, window_bounds = array<i64: 2, 128>}, {transform_indices = @transform_1, window_bounds = array<i64: 2, 128>}, {transform_indices = @transform_2, window_bounds = array<i64: 2, 128>}, {transform_indices = @transform_3, window_bounds = array<i64: 2, 128>}, {transform_indices = @transform_4, window_bounds = array<i64: 2, 128>}, {transform_indices = @transform_5, window_bounds = array<i64: 1, 1, 128>}, {transform_indices = @transform_6, window_bounds = array<i64: 1, 1, 128>}]} {
    %c0_i32 = arith.constant 0 : i32
    %0 = arith.cmpi eq, %arg1, %c0_i32 : i32
    %1 = arith.extui %0 : i1 to i32
    %c0_i32_0 = arith.constant 0 : i32
    %2 = arith.cmpi ne, %1, %c0_i32_0 : i32
    scf.if %2 {
      %cst_38 = arith.constant 0.000000e+00 : f32
      %78 = vector.broadcast %cst_38 : f32 to vector<1x1x128xf32>
      %c0_39 = arith.constant 0 : index
      %c0_40 = arith.constant 0 : index
      %c0_41 = arith.constant 0 : index
      %79 = vector.load %arg7[%c0_39, %c0_40, %c0_41] : memref<1x1x128xf32, #tpu.memory_space<vmem>>, vector<1x1x128xf32>
      tpu.vector_store %arg7[%c0_39, %c0_40, %c0_41], %78 {strides = array<i32>} : memref<1x1x128xf32, #tpu.memory_space<vmem>>, vector<1x1x128xf32>,
      %cst_42 = arith.constant 0.000000e+00 : f32
      %80 = vector.broadcast %cst_42 : f32 to vector<1x1x128xf32>
      %c0_43 = arith.constant 0 : index
      %c0_44 = arith.constant 0 : index
      %c0_45 = arith.constant 0 : index
      %81 = vector.load %arg8[%c0_43, %c0_44, %c0_45] : memref<1x1x128xf32, #tpu.memory_space<vmem>>, vector<1x1x128xf32>
      tpu.vector_store %arg8[%c0_43, %c0_44, %c0_45], %80 {strides = array<i32>} : memref<1x1x128xf32, #tpu.memory_space<vmem>>, vector<1x1x128xf32>,
    } else {
    }
    %c0 = arith.constant 0 : index
    %c0_1 = arith.constant 0 : index
    %3 = vector.load %arg2[%c0, %c0_1] : memref<2x128xf32, #tpu.memory_space<vmem>>, vector<2x128xf32>
    %c0_2 = arith.constant 0 : index
    %c0_3 = arith.constant 0 : index
    %4 = vector.load %arg3[%c0_2, %c0_3] : memref<2x128xf32, #tpu.memory_space<vmem>>, vector<2x128xf32>
    %c0_4 = arith.constant 0 : index
    %c0_5 = arith.constant 0 : index
    %5 = vector.load %arg4[%c0_4, %c0_5] : memref<2x128xf32, #tpu.memory_space<vmem>>, vector<2x128xf32>
    %c0_6 = arith.constant 0 : index
    %c0_7 = arith.constant 0 : index
    %6 = vector.load %arg5[%c0_6, %c0_7] : memref<2x128xf32, #tpu.memory_space<vmem>>, vector<2x128xf32>
    %c0_8 = arith.constant 0 : index
    %c0_9 = arith.constant 0 : index
    %7 = vector.load %arg6[%c0_8, %c0_9] : memref<2x128xf32, #tpu.memory_space<vmem>>, vector<2x128xf32>
    %8 = arith.subf %3, %4 : vector<2x128xf32>
    %9 = arith.mulf %5, %8 : vector<2x128xf32>
    %10 = arith.mulf %9, %8 : vector<2x128xf32>
    %cst = arith.constant 2.000000e+00 : f32
    %11 = vector.broadcast %cst : f32 to vector<2x128xf32>
    %12 = arith.mulf %11, %7 : vector<2x128xf32>
    %cst_10 = arith.constant 1.000000e+00 : f32
    %13 = vector.broadcast %cst_10 : f32 to vector<2x128xf32>
    %14 = arith.addf %13, %5 : vector<2x128xf32>
    %15 = arith.mulf %12, %14 : vector<2x128xf32>
    %16 = arith.addf %10, %15 : vector<2x128xf32>
    %cst_11 = arith.constant 2.000000e+00 : f32
    %17 = vector.broadcast %cst_11 : f32 to vector<2x128xf32>
    %18 = arith.addf %6, %17 : vector<2x128xf32>
    %cst_12 = arith.constant 5.000000e-01 : f32
    %19 = vector.broadcast %cst_12 : f32 to vector<2x128xf32>
    %20 = arith.divf %19, %18 : vector<2x128xf32>
    %cst_13 = arith.constant 5.000000e-01 : f32
    %21 = vector.broadcast %cst_13 : f32 to vector<2x128xf32>
    %22 = arith.addf %6, %21 : vector<2x128xf32>
    %cst_14 = arith.constant 1.500000e+00 : f32
    %23 = vector.broadcast %cst_14 : f32 to vector<2x128xf32>
    %24 = arith.addf %6, %23 : vector<2x128xf32>
    %25 = arith.mulf %22, %24 : vector<2x128xf32>
    %cst_15 = arith.constant 1.000000e+00 : f32
    %26 = vector.broadcast %cst_15 : f32 to vector<2x128xf32>
    %27 = arith.addf %6, %26 : vector<2x128xf32>
    %28 = arith.mulf %6, %27 : vector<2x128xf32>
    %29 = arith.divf %25, %28 : vector<2x128xf32>
    %30 = math.log %29 : vector<2x128xf32>
    %31 = arith.mulf %20, %20 : vector<2x128xf32>
    %cst_16 = arith.constant 1.000000e+00 : f32
    %32 = vector.broadcast %cst_16 : f32 to vector<2x128xf32>
    %33 = arith.subf %32, %20 : vector<2x128xf32>
    %34 = arith.mulf %20, %20 : vector<2x128xf32>
    %35 = arith.addf %33, %34 : vector<2x128xf32>
    %cst_17 = arith.constant 0.166666672 : f32
    %36 = vector.broadcast %cst_17 : f32 to vector<2x128xf32>
    %37 = arith.mulf %36, %35 : vector<2x128xf32>
    %38 = arith.mulf %31, %37 : vector<2x128xf32>
    %cst_18 = arith.constant 3.14159274 : f32
    %39 = vector.broadcast %cst_18 : f32 to vector<2x128xf32>
    %40 = arith.mulf %39, %16 : vector<2x128xf32>
    %41 = arith.mulf %5, %18 : vector<2x128xf32>
    %42 = arith.divf %40, %41 : vector<2x128xf32>
    %43 = math.log %42 : vector<2x128xf32>
    %cst_19 = arith.constant 5.000000e-01 : f32
    %44 = vector.broadcast %cst_19 : f32 to vector<2x128xf32>
    %45 = arith.mulf %44, %43 : vector<2x128xf32>
    %46 = arith.divf %10, %15 : vector<2x128xf32>
    %cst_20 = arith.constant 1.000000e+00 : f32
    %47 = vector.broadcast %cst_20 : f32 to vector<2x128xf32>
    %48 = arith.addf %47, %46 : vector<2x128xf32>
    %49 = math.log %48 : vector<2x128xf32>
    %50 = arith.mulf %6, %49 : vector<2x128xf32>
    %51 = arith.addf %45, %50 : vector<2x128xf32>
    %52 = arith.addf %51, %30 : vector<2x128xf32>
    %cst_21 = arith.constant 1.000000e+00 : f32
    %53 = vector.broadcast %cst_21 : f32 to vector<2x128xf32>
    %54 = arith.addf %53, %20 : vector<2x128xf32>
    %55 = math.log %54 : vector<2x128xf32>
    %56 = arith.mulf %18, %55 : vector<2x128xf32>
    %57 = arith.subf %52, %56 : vector<2x128xf32>
    %cst_22 = arith.constant 5.000000e-01 : f32
    %58 = vector.broadcast %cst_22 : f32 to vector<2x128xf32>
    %59 = arith.addf %57, %58 : vector<2x128xf32>
    %60 = arith.addf %59, %38 : vector<2x128xf32>
    %61 = math.absf %8 : vector<2x128xf32>
    %cst_23 = arith.constant 2.000000e+00 : f32
    %62 = vector.broadcast %cst_23 : f32 to vector<2x128xf32>
    %63 = arith.mulf %62, %5 : vector<2x128xf32>
    %64 = arith.mulf %63, %6 : vector<2x128xf32>
    %65 = arith.mulf %61, %64 : vector<2x128xf32>
    %c0_24 = arith.constant 0 : index
    %c0_25 = arith.constant 0 : index
    %c0_26 = arith.constant 0 : index
    %66 = vector.load %arg7[%c0_24, %c0_25, %c0_26] : memref<1x1x128xf32, #tpu.memory_space<vmem>>, vector<1x1x128xf32>
    %cst_27 = arith.constant dense<0.000000e+00> : vector<128xf32>
    %67 = vector.multi_reduction <add>, %60, %cst_27 [0] : vector<2x128xf32> to vector<128xf32>
    %68 = vector.shape_cast %67 : vector<128xf32> to vector<1x128xf32>
    %69 = vector.shape_cast %68 : vector<1x128xf32> to vector<1x1x128xf32>
    %70 = arith.addf %66, %69 : vector<1x1x128xf32>
    %c0_28 = arith.constant 0 : index
    %c0_29 = arith.constant 0 : index
    %c0_30 = arith.constant 0 : index
    %71 = vector.load %arg7[%c0_28, %c0_29, %c0_30] : memref<1x1x128xf32, #tpu.memory_space<vmem>>, vector<1x1x128xf32>
    tpu.vector_store %arg7[%c0_28, %c0_29, %c0_30], %70 {strides = array<i32>} : memref<1x1x128xf32, #tpu.memory_space<vmem>>, vector<1x1x128xf32>,
    %c0_31 = arith.constant 0 : index
    %c0_32 = arith.constant 0 : index
    %c0_33 = arith.constant 0 : index
    %72 = vector.load %arg8[%c0_31, %c0_32, %c0_33] : memref<1x1x128xf32, #tpu.memory_space<vmem>>, vector<1x1x128xf32>
    %cst_34 = arith.constant dense<0.000000e+00> : vector<128xf32>
    %73 = vector.multi_reduction <add>, %65, %cst_34 [0] : vector<2x128xf32> to vector<128xf32>
    %74 = vector.shape_cast %73 : vector<128xf32> to vector<1x128xf32>
    %75 = vector.shape_cast %74 : vector<1x128xf32> to vector<1x1x128xf32>
    %76 = arith.addf %72, %75 : vector<1x1x128xf32>
    %c0_35 = arith.constant 0 : index
    %c0_36 = arith.constant 0 : index
    %c0_37 = arith.constant 0 : index
    %77 = vector.load %arg8[%c0_35, %c0_36, %c0_37] : memref<1x1x128xf32, #tpu.memory_space<vmem>>, vector<1x1x128xf32>
    tpu.vector_store %arg8[%c0_35, %c0_36, %c0_37], %76 {strides = array<i32>} : memref<1x1x128xf32, #tpu.memory_space<vmem>>, vector<1x1x128xf32>,
    return
  }
  func.func @transform_0(%arg0: i32, %arg1: i32) -> (i32, i32) {
    %c1_i32 = arith.constant 1 : i32
    %0 = arith.muli %arg0, %c1_i32 : i32
    %1 = arith.addi %0, %arg1 : i32
    %c0_i32 = arith.constant 0 : i32
    %2 = arith.minsi %1, %c0_i32 : i32
    %c0_i32_0 = arith.constant 0 : i32
    %c0_i32_1 = arith.constant 0 : i32
    return %2, %c0_i32_0 : i32, i32
  }
  func.func @transform_1(%arg0: i32, %arg1: i32) -> (i32, i32) {
    %c1_i32 = arith.constant 1 : i32
    %0 = arith.muli %arg0, %c1_i32 : i32
    %1 = arith.addi %0, %arg1 : i32
    %c0_i32 = arith.constant 0 : i32
    %2 = arith.minsi %1, %c0_i32 : i32
    %c0_i32_0 = arith.constant 0 : i32
    %c0_i32_1 = arith.constant 0 : i32
    return %2, %c0_i32_0 : i32, i32
  }
  func.func @transform_2(%arg0: i32, %arg1: i32) -> (i32, i32) {
    %c1_i32 = arith.constant 1 : i32
    %0 = arith.muli %arg0, %c1_i32 : i32
    %1 = arith.addi %0, %arg1 : i32
    %c0_i32 = arith.constant 0 : i32
    %2 = arith.minsi %1, %c0_i32 : i32
    %c0_i32_0 = arith.constant 0 : i32
    %c0_i32_1 = arith.constant 0 : i32
    return %2, %c0_i32_0 : i32, i32
  }
  func.func @transform_3(%arg0: i32, %arg1: i32) -> (i32, i32) {
    %c1_i32 = arith.constant 1 : i32
    %0 = arith.muli %arg0, %c1_i32 : i32
    %1 = arith.addi %0, %arg1 : i32
    %c0_i32 = arith.constant 0 : i32
    %2 = arith.minsi %1, %c0_i32 : i32
    %c0_i32_0 = arith.constant 0 : i32
    %c0_i32_1 = arith.constant 0 : i32
    return %2, %c0_i32_0 : i32, i32
  }
  func.func @transform_4(%arg0: i32, %arg1: i32) -> (i32, i32) {
    %c1_i32 = arith.constant 1 : i32
    %0 = arith.muli %arg0, %c1_i32 : i32
    %1 = arith.addi %0, %arg1 : i32
    %c0_i32 = arith.constant 0 : i32
    %2 = arith.minsi %1, %c0_i32 : i32
    %c0_i32_0 = arith.constant 0 : i32
    %c0_i32_1 = arith.constant 0 : i32
    return %2, %c0_i32_0 : i32, i32
  }
  func.func @transform_5(%arg0: i32, %arg1: i32) -> (i32, i32, i32) {
    %c0_i32 = arith.constant 0 : i32
    %c0_i32_0 = arith.constant 0 : i32
    %c0_i32_1 = arith.constant 0 : i32
    return %arg0, %c0_i32, %c0_i32_0 : i32, i32, i32
  }
  func.func @transform_6(%arg0: i32, %arg1: i32) -> (i32, i32, i32) {
    %c0_i32 = arith.constant 0 : i32
    %c0_i32_0 = arith.constant 0 : i32
    %c0_i32_1 = arith.constant 0 : i32
    return %arg0, %c0_i32, %c0_i32_0 : i32, i32, i32
  }
}

</mosaic_0001>

<bundles_post_ra>
// kernel: tpu_custom_call.1
= control target key start
LH: loop header
LB: loop body
LE: loop exit
PB: predicated region body
PF: predicated region fallthrough
CT: control target
= control target key end

     0   :  { %12 = vsyncpa [#allocation3], 0  ;;  %s465_s0 = inlined_call_operand.hbm [shape: f32[2,128], index: 0, kind: input, shape index: {}]   ;;  %s466_s1 = inlined_call_operand.hbm [shape: f32[2,128], index: 1, kind: input, shape index: {}]   ;;  %s467_s2 = inlined_call_operand.vmem [shape: f32[2,128], index: 2, kind: input, shape index: {}]   ;;  %s468_s3 = inlined_call_operand.vmem [shape: f32[2,128], index: 3, kind: input, shape index: {}]   ;;  %s469_s4 = inlined_call_operand.vmem [shape: f32[2,128], index: 4, kind: input, shape index: {}]   ;;  %s470_s5 = inlined_call_operand.hbm [shape: f32[1,1,128], index: 5, kind: output, shape index: {0}]   ;;  %s471_s6 = inlined_call_operand.hbm [shape: f32[1,1,128], index: 6, kind: output, shape index: {1}]  }
   0x1   :  { %13 = vsyncpa [#allocation6], 0 }
   0x2   :  { %14 = vsyncpa [#allocation4], 0 }
   0x3   :  { %15 = vsyncpa [#allocation9], 0  ;;  %s388_s21 = smov [#allocation2]   ;;  %s389_s23 = smov [#allocation5]  }
   0x4   :  { %s27_s22 = sshll.u32 %s388_s21, 4  ;;  %s42_s24 = sshll.u32 %s389_s23, 4  ;;  %s28_s22 = int_to_ptr.vmem [resolvable:$true] %s27_s22  ;;  %s43_s24 = int_to_ptr.vmem [resolvable:$true] %s42_s24 }
   0x5   :  { %s308_s25 = scalar_lea.vmem %s28_s22, 32  ;;  %p313_p1 = scmp.lt.s32.totalorder %s28_s22, %s28_s22 }
   0x6   :  { %p309_p0 = scmp.ne.s32.totalorder %s28_s22, %s308_s25  ;;  %p314_p2 = scmp.lt.s32.totalorder %s308_s25, %s308_s25 }
   0x8   :  { %p315_p3 = por %p314_p2, %p313_p1 }
   0xa   :  { %p316_p4 = pnand %p315_p3, %p309_p0 }
   0xc   :  { %319 = shalt.err (!%p316_p4)
}
   0xd   :  { %30 = dma.hbm_to_vmem [thread:$0]  %s465_s0, 32, %s28_s22, [#allocation3]  }
   0xe   :  { %s328_s28 = scalar_lea.vmem %s43_s24, 32  ;;  %p333_p6 = scmp.lt.s32.totalorder %s43_s24, %s43_s24 }
   0xf   :  { %p329_p5 = scmp.ne.s32.totalorder %s43_s24, %s328_s28  ;;  %p334_p7 = scmp.lt.s32.totalorder %s328_s28, %s328_s28 }
  0x11   :  { %p335_p8 = por %p334_p7, %p333_p6 }
  0x13   :  { %p336_p9 = pnand %p335_p8, %p329_p5 }
  0x15   :  { %339 = shalt.err (!%p336_p9)
}
  0x16   :  { %45 = dma.hbm_to_vmem [thread:$0]  %s466_s1, 32, %s43_s24, [#allocation6]  }
  0x17   :  { %380 = dma.done.wait [#allocation3], 32  }
  0x18   :  { %381 = vsyncadd [#allocation3], 4294967264 }
  0x19   :  { %382 = dma.done.wait [#allocation6], 32  }
  0x1a   :  { %383 = vsyncadd [#allocation6], 4294967264  ;;  %v390_v0 = vmov 0.0   ;;  %v151_v1 = vld [vmem:[#allocation2] sm:$0x3]  ;;  %vm207_vm0 = vcmask 1041408  }
  0x1b   :  { %149 = vst [vmem:[#allocation7] sm:$0x1] %v390_v0  ;;  %150 = vst [vmem:[#allocation8] sm:$0x1] %v390_v0  ;;  %v152_v2 = vld [vmem:[#allocation5] sm:$0x3] }
  0x1c   :  { %v153_v3 = vld [vmem:[%s467_s2] sm:$0x3]  ;;  %v156_v6 = vsub.f32 %v151_v1, %v152_v2  ;;  %s391_s2 = smov [#allocation8]  }
  0x1d   :  { %v440_v4 = vld [vmem:[%s468_s3] sm:$0x3]  ;;  %v160_v7 = vadd.f32 1.0, %v153_v3  ;;  %v203_v8 = vmul.f32 2.0, %v153_v3  ;;  %s243_s3 = sshll.u32 %s391_s2, 4  ;;  %s244_s3 = int_to_ptr.vmem [resolvable:$true] %s243_s3 }
  0x1e   :  { %v155_v5 = vld [vmem:[%s469_s4] sm:$0x3]  ;;  %v446_v10 = vadd.f32 2.0, %v440_v4  ;;  %v169_v11 = vadd.f32 1.0, %v440_v4  ;;  %v202_v12 = vand.u32 2147483647, %v156_v6  ;;  %v157_v14 = vmul.f32 %v156_v6, %v153_v3  ;;  %p345_p11 = scmp.lt.s32.totalorder %s244_s3, %s244_s3 }
  0x1f   :  { %v159_v9 = vmul.f32 2.0, %v155_v5  ;;  %v204_v13 = vmul.f32 %v203_v8, %v440_v4  ;;  %v166_v25 = vadd.f32 0.5, %v440_v4  ;;  %v167_v26 = vadd.f32 1.5, %v440_v4  ;;  %s340_s4 = scalar_lea.vmem %s244_s3, 16  ;;  %s344_s11 = scalar_lea.vmem %s244_s3, 32 }
  0x20   :  { %284 = vrcp.f32 %v446_v10  ;;  %v181_v16 = vmul.f32 %v446_v10, %v153_v3  ;;  %v170_v17 = vmul.f32 %v169_v11, %v440_v4  ;;  %v158_v20 = vmul.f32 %v157_v14, %v156_v6  ;;  %p341_p10 = scmp.ne.s32.totalorder %s244_s3, %s340_s4  ;;  %p346_p12 = scmp.lt.s32.totalorder %s344_s11, %s340_s4 }
  0x21   :  { %v161_v15 = vmul.f32 %v160_v7, %v159_v9  ;;  %v205_v18 = vmul.f32 %v204_v13, %v202_v12  ;;  %v168_v31 = vmul.f32 %v167_v26, %v166_v25 }
  0x22   :  { %286 = vrcp.f32 %v181_v16  ;;  %v217_v33 = vld [vmem:[#allocation8] sm:$0x1]  ;;  %p347_p13 = por %p346_p12, %p345_p11 }
  0x23   :  { %288 = vrcp.f32 %v170_v17  ;;  %v218_v19 = vsel %vm207_vm0, %v205_v18, 0.0  ;;  %v162_v23 = vadd.f32 %v161_v15, %v158_v20 }
  0x24   :  { %290 = vrcp.f32 %v161_v15  ;;  %v219_v21 = vrot.slane %v218_v19, 4  ;;  %p348_p0 = pnand %p347_p13, %p341_p10 }
  0x25   :  { %v180_v28 = vmul.f32 3.1415927, %v162_v23 }
  0x26   :  { %v220_v22 = vadd.f32 %v219_v21, %v218_v19 }
  0x28   :  { %v221_v24 = vrot.slane %v220_v22, 2 }
  0x2a   :  { %v222_v27 = vadd.f32 %v221_v24, %v220_v22 }
  0x2c   :  { %v223_v29 = vrot.slane %v222_v27, 1 }
  0x2d   :  { %v285_v30 = vpop.eup %284 }
  0x2e   :  { %v165_v32 = vmul.f32 0.5, %v285_v30  ;;  %v224_v34 = vadd.f32 %v223_v29, %v222_v27 }
  0x2f   :  { %v287_v35 = vpop.eup %286 }
  0x30   :  { %v289_v36 = vpop.eup %288  ;;  %v183_v37 = vmul.f32 %v287_v35, %v180_v28  ;;  %v195_v38 = vadd.f32 1.0, %v165_v32  ;;  %v225_v41 = vadd.f32 %v224_v34, %v217_v33 }
  0x31   :  { %v291_v39 = vpop.eup %290  ;;  %v172_v40 = vmul.f32 %v289_v36, %v168_v31 }
  0x32   :  { %292 = vlog2.f32 %v183_v37  ;;  %v188_v42 = vmul.f32 %v291_v39, %v158_v20  ;;  %226 = vst [vmem:[#allocation8] sm:$0x1] %v225_v41 }
  0x33   :  { %294 = vlog2.f32 %v195_v38 }
  0x34   :  { %v189_v43 = vadd.f32 1.0, %v188_v42 }
  0x35   :  { %351 = shalt.err (!%p348_p0)
}
  0x36   :  { %246 = dma.vmem_to_hbm [thread:$0]  %s244_s3, 16, %s471_s6, [#allocation9]   ;;  %296 = vlog2.f32 %v172_v40  ;;  %v175_v45 = vmul.f32 %v165_v32, %v165_v32  ;;  %v176_v46 = vsub.f32 1.0, %v165_v32  ;;  %v206_v8 = vld [vmem:[#allocation7] sm:$0x1] }
  0x37   :  { %298 = vlog2.f32 %v189_v43  ;;  %s392_s6 = smov [#allocation7]  }
  0x38   :  { %v177_v51 = vadd.f32 %v176_v46, %v175_v45  ;;  %s233_s14 = sshll.u32 %s392_s6, 4  ;;  %s234_s14 = int_to_ptr.vmem [resolvable:$true] %s233_s14 }
  0x39   :  { %s360_s15 = scalar_lea.vmem %s234_s14, 16  ;;  %s364_s16 = scalar_lea.vmem %s234_s14, 32 }
  0x3a   :  { %v178_v57 = vmul.f32 0.16666667, %v177_v51  ;;  %p361_p1 = scmp.ne.s32.totalorder %s234_s14, %s360_s15  ;;  %p365_p2 = scmp.lt.s32.totalorder %s234_s14, %s234_s14 }
  0x3b   :  { %p366_p3 = scmp.lt.s32.totalorder %s364_s16, %s360_s15 }
  0x3c   :  { %v179_v61 = vmul.f32 %v178_v57, %v175_v45 }
  0x3d   :  { %p367_p4 = por %p366_p3, %p365_p2 }
  0x3f   :  { %v293_v44 = vpop.eup %292  ;;  %p368_p5 = pnand %p367_p4, %p361_p1 }
  0x40   :  { %v185_v47 = vmul.f32 0.6931472, %v293_v44  ;;  %v295_v48 = vpop.eup %294 }
  0x41   :  { %v197_v54 = vmul.f32 0.6931472, %v295_v48 }
  0x42   :  { %v186_v52 = vmul.f32 0.5, %v185_v47 }
  0x43   :  { %v297_v49 = vpop.eup %296  ;;  %v198_v59 = vmul.f32 %v197_v54, %v446_v10 }
  0x44   :  { %v299_v50 = vpop.eup %298  ;;  %v174_v55 = vmul.f32 0.6931472, %v297_v49 }
  0x45   :  { %v191_v53 = vmul.f32 0.6931472, %v299_v50 }
  0x47   :  { %v192_v56 = vmul.f32 %v191_v53, %v440_v4 }
  0x49   :  { %v193_v58 = vadd.f32 %v192_v56, %v186_v52 }
  0x4b   :  { %v194_v60 = vadd.f32 %v193_v58, %v174_v55 }
  0x4d   :  { %v199_v62 = vsub.f32 %v194_v60, %v198_v59 }
  0x4f   :  { %v200_v63 = vadd.f32 0.5, %v199_v62 }
  0x51   :  { %v201_v0 = vadd.f32 %v200_v63, %v179_v61 }
  0x53   :  { %v208_v1 = vsel %vm207_vm0, %v201_v0, 0.0 }
  0x54   :  { %v209_v2 = vrot.slane %v208_v1, 4 }
  0x56   :  { %v210_v3 = vadd.f32 %v209_v2, %v208_v1 }
  0x58   :  { %v211_v5 = vrot.slane %v210_v3, 2 }
  0x5a   :  { %v212_v6 = vadd.f32 %v211_v5, %v210_v3 }
  0x5c   :  { %v213_v7 = vrot.slane %v212_v6, 1 }
  0x5e   :  { %v214_v4 = vadd.f32 %v213_v7, %v212_v6 }
  0x60   :  { %v215_v9 = vadd.f32 %v214_v4, %v206_v8 }
  0x62   :  { %216 = vst [vmem:[#allocation7] sm:$0x1] %v215_v9 }
  0x63   :  { %371 = shalt.err (!%p368_p5)
}
  0x64   :  { %236 = dma.vmem_to_hbm [thread:$0]  %s234_s14, 16, %s470_s5, [#allocation4]  }
  0x65   :  { %384 = dma.done.wait [#allocation4], 16  }
  0x66   :  { %385 = vsyncadd [#allocation4], 4294967280 }
  0x67   :  { %386 = dma.done.wait [#allocation9], 16  }
  0x68   :  { %387 = vsyncadd [#allocation9], 4294967280 }
  0x69   :  { %253 = vsyncpa [#allocation3], 1 }
  0x6a   :  { %254 = vsyncpa [#allocation6], 1 }
  0x6b   :  { %255 = vsyncpa [#allocation4], 1 }
  0x6c   :  { %256 = vsyncpa [#allocation9], 1 }

</bundles_post_ra>
